<compile_context>
chip_gen: v7x
topology: tpu7x:2x2x1
jax: 0.10.0
libtpu: 0.0.40
codegen_flags: <defaults>
</compile_context>

<pallas_src>
import jax
import jax.numpy as jnp
from jax.experimental import pallas as pl
from jax.experimental.pallas import tpu as pltpu

_D_IN = 784       # 28 * 28
_H1 = 256
_H2 = 64
_H2_PAD = 128     # lane-dense hidden 2
_D_OUT = 10
_D_OUT_PAD = 128  # lane-dense logits
_TB = 256         # batch tile (multiple of 16 for bf16 sublane packing)


def _mlp_kernel(x_ref, w1_ref, b1_ref, w2_ref, b2_ref, w3_ref, b3_ref, o_ref):
    # x: (TB, 784) bf16; weights bf16; biases f32; output f32 (TB, 128).
    x = x_ref[...]
    # layer 1: (TB, 784) @ (784, 256), f32 accumulate, bias + ReLU in f32
    h1 = jnp.dot(x, w1_ref[...], preferred_element_type=jnp.float32)
    h1 = jnp.maximum(h1 + b1_ref[...], 0.0)
    # layer 2: (TB, 256) @ (256, 128)  (cols 64..127 are zero-padded)
    h2 = jnp.dot(h1.astype(jnp.bfloat16), w2_ref[...],
                 preferred_element_type=jnp.float32)
    h2 = jnp.maximum(h2 + b2_ref[...], 0.0)
    # layer 3: (TB, 128) @ (128, 128)  (extra rows/cols zero-padded)
    h3 = jnp.dot(h2.astype(jnp.bfloat16), w3_ref[...],
                 preferred_element_type=jnp.float32)
    # Module applies ReLU after the final layer as well.
    o_ref[...] = jnp.maximum(h3 + b3_ref[...], 0.0).astype(o_ref.dtype)


def _round_up(n, m):
    return ((n + m - 1) // m) * m


def mlp_forward(x, params):
    """x: [B, 1, 28, 28] or [B, 784] float32. Returns [B, 10] float32."""
    w1, b1, w2, b2, w3, b3 = params
    x2d = x.reshape(-1, _D_IN).astype(jnp.float32)  # same as x.view(-1, 784)
    B = x2d.shape[0]

    # ---- batch padding / tile size -------------------------------------
    b_min = _round_up(B, 16)                 # bf16 sublane packing
    if b_min <= _TB:
        tb = b_min
        b_pad = b_min
    else:
        tb = _TB
        b_pad = _round_up(B, _TB)
    if b_pad != B:
        x2d = jnp.pad(x2d, ((0, b_pad - B), (0, 0)))
    n_blocks = b_pad // tb

    # ---- weight / bias prep (bf16 weights, lane-dense padding) ---------
    w1b = w1.astype(jnp.bfloat16)                                   # (784, 256)
    b1f = b1.reshape(1, _H1).astype(jnp.float32)                    # (1, 256)
    w2b = jnp.pad(w2, ((0, 0), (0, _H2_PAD - _H2))).astype(jnp.bfloat16)   # (256, 128)
    b2f = jnp.pad(b2.reshape(1, _H2),
                  ((0, 0), (0, _H2_PAD - _H2))).astype(jnp.float32)        # (1, 128)
    w3b = jnp.pad(w3, ((0, _H2_PAD - _H2),
                       (0, _D_OUT_PAD - _D_OUT))).astype(jnp.bfloat16)     # (128, 128)
    b3f = jnp.pad(b3.reshape(1, _D_OUT),
                  ((0, 0), (0, _D_OUT_PAD - _D_OUT))).astype(jnp.float32)  # (1, 128)
    xb = x2d.astype(jnp.bfloat16)

    # ---- specs ----------------------------------------------------------
    resident = lambda shape: pl.BlockSpec(shape, lambda i: (0,) * len(shape))
    in_specs = [
        pl.BlockSpec((tb, _D_IN), lambda i: (i, 0)),   # x: streamed over batch
        resident(w1b.shape), resident(b1f.shape),
        resident(w2b.shape), resident(b2f.shape),
        resident(w3b.shape), resident(b3f.shape),
    ]
    out_spec = pl.BlockSpec((tb, _D_OUT_PAD), lambda i: (i, 0))

    flops = 2 * b_pad * (_D_IN * _H1 + _H1 * _H2_PAD + _H2_PAD * _D_OUT_PAD)
    bytes_accessed = (
        xb.size * 2
        + w1b.size * 2 + w2b.size * 2 + w3b.size * 2
        + b1f.size * 4 + b2f.size * 4 + b3f.size * 4
        + b_pad * _D_OUT_PAD * 4
    )

    out_pad = pl.pallas_call(
        _mlp_kernel,
        out_shape=jax.ShapeDtypeStruct((b_pad, _D_OUT_PAD), jnp.float32),
        grid=(n_blocks,),
        in_specs=in_specs,
        out_specs=out_spec,
        compiler_params=pltpu.CompilerParams(
            dimension_semantics=("parallel",),
        ),
        cost_estimate=pl.CostEstimate(
            flops=flops, transcendentals=0, bytes_accessed=bytes_accessed),
    )(xb, w1b, b1f, w2b, b2f, w3b, b3f)

    return out_pad[:B, :_D_OUT]


def init_params(key):
    """Deterministic init matching nn.Linear shapes (weights stored transposed)."""
    dims = [(_D_IN, _H1), (_H1, _H2), (_H2, _D_OUT)]
    params = []
    for i, (d_in, d_out) in enumerate(dims):
        kw, kb = jax.random.split(jax.random.fold_in(key, i))
        bound = 1.0 / jnp.sqrt(d_in)
        w = jax.random.uniform(kw, (d_in, d_out), jnp.float32, -bound, bound)
        b = jax.random.uniform(kb, (1, d_out), jnp.float32, -bound, bound)
        params += [w, b]
    return tuple(params)


if __name__ == "__main__":
    key = jax.random.PRNGKey(0)
    params = init_params(key)

    # Small MNIST-like batch: [B=2, C=1, H=28, W=28]
    x = jax.random.normal(jax.random.fold_in(key, 100), (2, 1, 28, 28), jnp.float32)

    out = mlp_forward(x, params)
    out = jax.block_until_ready(out)

    # Reference check in plain JAX (f32 math; kernel uses bf16 inputs with
    # f32 accumulation, so use a loose-but-meaningful tolerance).
    x2d = x.reshape(-1, _D_IN)
    w1, b1, w2, b2, w3, b3 = params
    ref = jnp.maximum(x2d @ w1 + b1, 0.0)
    ref = jnp.maximum(ref @ w2 + b2, 0.0)
    ref = jnp.maximum(ref @ w3 + b3, 0.0)
    assert out.shape == (2, _D_OUT)
    assert jnp.allclose(out, ref, atol=5e-2, rtol=5e-2)

    print("KERNEL_OK")
</pallas_src>

<mosaic_0001>
module attributes {stable_mosaic.version = 11 : i64} {
  func.func @_mlp_kernel(%arg0: i32, %arg1: memref<16x784xbf16, #tpu.memory_space<vmem>>, %arg2: memref<784x256xbf16, #tpu.memory_space<vmem>>, %arg3: memref<1x256xf32, #tpu.memory_space<vmem>>, %arg4: memref<256x128xbf16, #tpu.memory_space<vmem>>, %arg5: memref<1x128xf32, #tpu.memory_space<vmem>>, %arg6: memref<128x128xbf16, #tpu.memory_space<vmem>>, %arg7: memref<1x128xf32, #tpu.memory_space<vmem>>, %arg8: memref<16x128xf32, #tpu.memory_space<vmem>>) attributes {dimension_semantics = [#tpu.dimension_semantics<parallel>], iteration_bounds = array<i64: 1>, scalar_prefetch = 0 : i64, scratch_operands = 0 : i64, tpu.core_type = #tpu.core_type<tc>, window_params = [{transform_indices = @transform_0, window_bounds = array<i64: 16, 784>}, {pipeline_mode = #tpu.pipeline_mode<synchronous>, transform_indices = @transform_1, window_bounds = array<i64: 784, 256>}, {pipeline_mode = #tpu.pipeline_mode<synchronous>, transform_indices = @transform_2, window_bounds = array<i64: 1, 256>}, {pipeline_mode = #tpu.pipeline_mode<synchronous>, transform_indices = @transform_3, window_bounds = array<i64: 256, 128>}, {pipeline_mode = #tpu.pipeline_mode<synchronous>, transform_indices = @transform_4, window_bounds = array<i64: 1, 128>}, {pipeline_mode = #tpu.pipeline_mode<synchronous>, transform_indices = @transform_5, window_bounds = array<i64: 128, 128>}, {pipeline_mode = #tpu.pipeline_mode<synchronous>, transform_indices = @transform_6, window_bounds = array<i64: 1, 128>}, {transform_indices = @transform_7, window_bounds = array<i64: 16, 128>}]} {
    %c0 = arith.constant 0 : index
    %c0_0 = arith.constant 0 : index
    %0 = vector.load %arg1[%c0, %c0_0] : memref<16x784xbf16, #tpu.memory_space<vmem>>, vector<16x784xbf16>
    %c0_1 = arith.constant 0 : index
    %c0_2 = arith.constant 0 : index
    %1 = vector.load %arg2[%c0_1, %c0_2] : memref<784x256xbf16, #tpu.memory_space<vmem>>, vector<784x256xbf16>
    %cst = arith.constant dense<0.000000e+00> : vector<16x256xf32>
    %2 = tpu.matmul %0, %1, %cst {dimension_numbers = #tpu.dot_dimension_numbers<[1], [0], [0], [1], [0, 0, 1, 1], [], []>} : vector<16x784xbf16>, vector<784x256xbf16>, vector<16x256xf32> -> vector<16x256xf32>
    %c0_3 = arith.constant 0 : index
    %c0_4 = arith.constant 0 : index
    %3 = vector.load %arg3[%c0_3, %c0_4] : memref<1x256xf32, #tpu.memory_space<vmem>>, vector<1x256xf32>
    %4 = vector.broadcast %3 : vector<1x256xf32> to vector<16x256xf32>
    %5 = arith.addf %2, %4 : vector<16x256xf32>
    %cst_5 = arith.constant 0.000000e+00 : f32
    %6 = vector.broadcast %cst_5 : f32 to vector<16x256xf32>
    %7 = arith.maximumf %5, %6 : vector<16x256xf32>
    %8 = arith.truncf %7 : vector<16x256xf32> to vector<16x256xbf16>
    %c0_6 = arith.constant 0 : index
    %c0_7 = arith.constant 0 : index
    %9 = vector.load %arg4[%c0_6, %c0_7] : memref<256x128xbf16, #tpu.memory_space<vmem>>, vector<256x128xbf16>
    %cst_8 = arith.constant dense<0.000000e+00> : vector<16x128xf32>
    %10 = tpu.matmul %8, %9, %cst_8 {dimension_numbers = #tpu.dot_dimension_numbers<[1], [0], [0], [1], [0, 0, 1, 1], [], []>} : vector<16x256xbf16>, vector<256x128xbf16>, vector<16x128xf32> -> vector<16x128xf32>
    %c0_9 = arith.constant 0 : index
    %c0_10 = arith.constant 0 : index
    %11 = vector.load %arg5[%c0_9, %c0_10] : memref<1x128xf32, #tpu.memory_space<vmem>>, vector<1x128xf32>
    %12 = vector.broadcast %11 : vector<1x128xf32> to vector<16x128xf32>
    %13 = arith.addf %10, %12 : vector<16x128xf32>
    %cst_11 = arith.constant 0.000000e+00 : f32
    %14 = vector.broadcast %cst_11 : f32 to vector<16x128xf32>
    %15 = arith.maximumf %13, %14 : vector<16x128xf32>
    %16 = arith.truncf %15 : vector<16x128xf32> to vector<16x128xbf16>
    %c0_12 = arith.constant 0 : index
    %c0_13 = arith.constant 0 : index
    %17 = vector.load %arg6[%c0_12, %c0_13] : memref<128x128xbf16, #tpu.memory_space<vmem>>, vector<128x128xbf16>
    %cst_14 = arith.constant dense<0.000000e+00> : vector<16x128xf32>
    %18 = tpu.matmul %16, %17, %cst_14 {dimension_numbers = #tpu.dot_dimension_numbers<[1], [0], [0], [1], [0, 0, 1, 1], [], []>} : vector<16x128xbf16>, vector<128x128xbf16>, vector<16x128xf32> -> vector<16x128xf32>
    %c0_15 = arith.constant 0 : index
    %c0_16 = arith.constant 0 : index
    %19 = vector.load %arg7[%c0_15, %c0_16] : memref<1x128xf32, #tpu.memory_space<vmem>>, vector<1x128xf32>
    %20 = vector.broadcast %19 : vector<1x128xf32> to vector<16x128xf32>
    %21 = arith.addf %18, %20 : vector<16x128xf32>
    %cst_17 = arith.constant 0.000000e+00 : f32
    %22 = vector.broadcast %cst_17 : f32 to vector<16x128xf32>
    %23 = arith.maximumf %21, %22 : vector<16x128xf32>
    %c0_18 = arith.constant 0 : index
    %c0_19 = arith.constant 0 : index
    %24 = vector.load %arg8[%c0_18, %c0_19] : memref<16x128xf32, #tpu.memory_space<vmem>>, vector<16x128xf32>
    tpu.vector_store %arg8[%c0_18, %c0_19], %23 {strides = array<i32>} : memref<16x128xf32, #tpu.memory_space<vmem>>, vector<16x128xf32>,
    return
  }
  func.func @transform_0(%arg0: i32) -> (i32, i32) {
    %c0_i32 = arith.constant 0 : i32
    %c0_i32_0 = arith.constant 0 : i32
    return %arg0, %c0_i32 : i32, i32
  }
  func.func @transform_1(%arg0: i32) -> (i32, i32) {
    %c0_i32 = arith.constant 0 : i32
    %c0_i32_0 = arith.constant 0 : i32
    %c0_i32_1 = arith.constant 0 : i32
    return %c0_i32, %c0_i32_0 : i32, i32
  }
  func.func @transform_2(%arg0: i32) -> (i32, i32) {
    %c0_i32 = arith.constant 0 : i32
    %c0_i32_0 = arith.constant 0 : i32
    %c0_i32_1 = arith.constant 0 : i32
    return %c0_i32, %c0_i32_0 : i32, i32
  }
  func.func @transform_3(%arg0: i32) -> (i32, i32) {
    %c0_i32 = arith.constant 0 : i32
    %c0_i32_0 = arith.constant 0 : i32
    %c0_i32_1 = arith.constant 0 : i32
    return %c0_i32, %c0_i32_0 : i32, i32
  }
  func.func @transform_4(%arg0: i32) -> (i32, i32) {
    %c0_i32 = arith.constant 0 : i32
    %c0_i32_0 = arith.constant 0 : i32
    %c0_i32_1 = arith.constant 0 : i32
    return %c0_i32, %c0_i32_0 : i32, i32
  }
  func.func @transform_5(%arg0: i32) -> (i32, i32) {
    %c0_i32 = arith.constant 0 : i32
    %c0_i32_0 = arith.constant 0 : i32
    %c0_i32_1 = arith.constant 0 : i32
    return %c0_i32, %c0_i32_0 : i32, i32
  }
  func.func @transform_6(%arg0: i32) -> (i32, i32) {
    %c0_i32 = arith.constant 0 : i32
    %c0_i32_0 = arith.constant 0 : i32
    %c0_i32_1 = arith.constant 0 : i32
    return %c0_i32, %c0_i32_0 : i32, i32
  }
  func.func @transform_7(%arg0: i32) -> (i32, i32) {
    %c0_i32 = arith.constant 0 : i32
    %c0_i32_0 = arith.constant 0 : i32
    return %arg0, %c0_i32 : i32, i32
  }
}

</mosaic_0001>

<bundles_post_ra>
// kernel: tpu_custom_call.1
= control target key start
LH: loop header
LB: loop body
LE: loop exit
PB: predicated region body
PF: predicated region fallthrough
CT: control target
= control target key end

     0   :  { %12 = vsyncpa [#allocation3], 0  ;;  %s1863_s0 = inlined_call_operand.hbm [shape: bf16[16,784], index: 0, kind: input, shape index: {}]   ;;  %s1864_s1 = inlined_call_operand.hbm [shape: bf16[784,256], index: 1, kind: input, shape index: {}]   ;;  %s1865_s2 = inlined_call_operand.vmem [shape: f32[1,256], index: 2, kind: input, shape index: {}]   ;;  %s1866_s3 = inlined_call_operand.hbm [shape: bf16[256,128], index: 3, kind: input, shape index: {}]   ;;  %s1867_s4 = inlined_call_operand.vmem [shape: f32[1,128], index: 4, kind: input, shape index: {}]   ;;  %s1868_s5 = inlined_call_operand.hbm [shape: bf16[128,128], index: 5, kind: input, shape index: {}]   ;;  %s1869_s6 = inlined_call_operand.vmem [shape: f32[1,128], index: 6, kind: input, shape index: {}]   ;;  %s1870_s7 = inlined_call_operand.hbm [shape: f32[16,128], index: 7, kind: output, shape index: {}]  }
   0x1   :  { %13 = vsyncpa [#allocation6], 0 }
   0x2   :  { %14 = vsyncpa [#allocation9], 0 }
   0x3   :  { %15 = vsyncpa [#allocation4], 0  ;;  %s1734_s24 = smov [#allocation5]   ;;  %s1616_s28 = scalar_lea.hbm %s1864_s1, 12544 }
   0x4   :  { %s33_s25 = sshll.u32 %s1734_s24, 4  ;;  %p1617_p0 = scmp.ne.s32.totalorder %s1864_s1, %s1616_s28  ;;  %s34_s25 = int_to_ptr.vmem [resolvable:$true] %s33_s25 }
   0x5   :  { %p1620_p1 = scmp.lt.u32.totalorder %s1616_s28, %s1864_s1 }
   0x7   :  { %p1622_p2 = pnand %p1620_p1, %p1617_p0 }
   0x9   :  { %1625 = shalt.err (!%p1622_p2)
}
   0xa   :  { %s1626_s10 = scalar_lea.vmem %s34_s25, 12544  ;;  %p1631_p4 = scmp.lt.s32.totalorder %s34_s25, %s34_s25 }
   0xb   :  { %p1627_p3 = scmp.ne.s32.totalorder %s34_s25, %s1626_s10  ;;  %p1632_p5 = scmp.lt.s32.totalorder %s1626_s10, %s1626_s10 }
   0xd   :  { %p1633_p6 = por %p1632_p5, %p1631_p4 }
   0xf   :  { %p1634_p7 = pnand %p1633_p6, %p1627_p3 }
  0x11   :  { %1637 = shalt.err (!%p1634_p7)
}
  0x12   :  { %s1735_s11 = smov 128   ;;  %s1736_s12 = smov 8  }
  0x13   :  { %39 = dma.hbm_to_vmem [thread:$0]  %s1864_s1, 12544, %s34_s25, [#allocation6], %s1735_s11, %s1735_s11, %s1736_s12  }
  0x14   :  { %s1737_s15 = smov [#allocation2]   ;;  %s1638_s19 = scalar_lea.hbm %s1863_s0, 896 }
  0x15   :  { %s21_s16 = sshll.u32 %s1737_s15, 4  ;;  %p1639_p8 = scmp.ne.s32.totalorder %s1863_s0, %s1638_s19  ;;  %s22_s16 = int_to_ptr.vmem [resolvable:$true] %s21_s16 }
  0x16   :  { %p1642_p9 = scmp.lt.u32.totalorder %s1638_s19, %s1863_s0 }
  0x18   :  { %p1644_p10 = pnand %p1642_p9, %p1639_p8 }
  0x1a   :  { %1647 = shalt.err (!%p1644_p10)
}
  0x1b   :  { %s1648_s24 = scalar_lea.vmem %s22_s16, 896  ;;  %p1653_p12 = scmp.lt.s32.totalorder %s22_s16, %s22_s16 }
  0x1c   :  { %p1649_p11 = scmp.ne.s32.totalorder %s22_s16, %s1648_s24  ;;  %p1654_p13 = scmp.lt.s32.totalorder %s1648_s24, %s1648_s24 }
  0x1e   :  { %p1655_p0 = por %p1654_p13, %p1653_p12 }
  0x20   :  { %p1656_p1 = pnand %p1655_p0, %p1649_p11 }
  0x22   :  { %1659 = shalt.err (!%p1656_p1)
}
  0x23   :  { %s1738_s1 = smov 448   ;;  %s1739_s25 = smov 28  }
  0x24   :  { %27 = dma.hbm_to_vmem [thread:$0]  %s1863_s0, 896, %s22_s16, [#allocation3], %s1738_s1, %s1738_s1, %s1739_s25  }
  0x25   :  { %s1740_s28 = smov [#allocation7]   ;;  %s1660_s9 = scalar_lea.hbm %s1866_s3, 2048 }
  0x26   :  { %s47_s29 = sshll.u32 %s1740_s28, 4  ;;  %p1661_p2 = scmp.ne.s32.totalorder %s1866_s3, %s1660_s9  ;;  %s48_s29 = int_to_ptr.vmem [resolvable:$true] %s47_s29 }
  0x27   :  { %p1664_p3 = scmp.lt.u32.totalorder %s1660_s9, %s1866_s3 }
  0x29   :  { %p1666_p4 = pnand %p1664_p3, %p1661_p2 }
  0x2b   :  { %1669 = shalt.err (!%p1666_p4)
}
  0x2c   :  { %s1670_s17 = scalar_lea.vmem %s48_s29, 2048  ;;  %p1675_p6 = scmp.lt.s32.totalorder %s48_s29, %s48_s29 }
  0x2d   :  { %p1671_p5 = scmp.ne.s32.totalorder %s48_s29, %s1670_s17  ;;  %p1676_p7 = scmp.lt.s32.totalorder %s1670_s17, %s1670_s17 }
  0x2f   :  { %p1677_p8 = por %p1676_p7, %p1675_p6 }
  0x31   :  { %p1678_p9 = pnand %p1677_p8, %p1671_p5 }
  0x33   :  { %1681 = shalt.err (!%p1678_p9)
}
  0x34   :  { %s1741_s0 = smov 64   ;;  %s1742_s16 = smov 4  }
  0x35   :  { %53 = dma.hbm_to_vmem [thread:$0]  %s1866_s3, 2048, %s48_s29, [#allocation6], %s1741_s0, %s1741_s0, %s1742_s16  }
  0x36   :  { %s1743_s20 = smov [#allocation8]   ;;  %s1682_s24 = scalar_lea.hbm %s1868_s5, 1024 }
  0x37   :  { %s61_s21 = sshll.u32 %s1743_s20, 4  ;;  %p1683_p10 = scmp.ne.s32.totalorder %s1868_s5, %s1682_s24  ;;  %s62_s21 = int_to_ptr.vmem [resolvable:$true] %s61_s21 }
  0x38   :  { %p1686_p11 = scmp.lt.u32.totalorder %s1682_s24, %s1868_s5 }
  0x3a   :  { %p1688_p12 = pnand %p1686_p11, %p1683_p10 }
  0x3c   :  { %1691 = shalt.err (!%p1688_p12)
}
  0x3d   :  { %s1692_s28 = scalar_lea.vmem %s62_s21, 1024  ;;  %p1697_p0 = scmp.lt.s32.totalorder %s62_s21, %s62_s21 }
  0x3e   :  { %p1693_p13 = scmp.ne.s32.totalorder %s62_s21, %s1692_s28  ;;  %p1698_p1 = scmp.lt.s32.totalorder %s1692_s28, %s1692_s28 }
  0x40   :  { %p1699_p2 = por %p1698_p1, %p1697_p0 }
  0x42   :  { %p1700_p3 = pnand %p1699_p2, %p1693_p13 }
  0x44   :  { %1703 = shalt.err (!%p1700_p3)
}
  0x45   :  { %67 = dma.hbm_to_vmem [thread:$0]  %s1868_s5, 1024, %s62_s21, [#allocation9], %s1741_s0, %s1741_s0, %s1742_s16  }
  0x46   :  { %1726 = dma.done.wait [#allocation3], 896  }
  0x47   :  { %1727 = vsyncadd [#allocation3], 4294966400 }
  0x48   :  { %1728 = dma.done.wait [#allocation6], 14592  }
  0x49   :  { %1729 = vsyncadd [#allocation6], 4294952704 }
  0x4a   :  { %1730 = dma.done.wait [#allocation9], 1024  }
  0x4b   :  { %1731 = vsyncadd [#allocation9], 4294966272  ;;  %v1435_v0 = vld [vmem:[#allocation5 + $0x104] ss:$8 sps:$4 sm:$0xff]   ;;  %v1437_v1 = vld [vmem:[#allocation5 + $0x100] ss:$8 sps:$4 sm:$0xff]  }
  0x4c   :  { %773 = vmatprep.subr.bf16.mxu0 %v1435_v0  ;;  %v1438_v2 = vld [vmem:[#allocation5 + $0x114] ss:$8 sps:$4 sm:$0xff]   ;;  %v1440_v3 = vld [vmem:[#allocation5 + $0x110] ss:$8 sps:$4 sm:$0xff]   ;;  %v1441_v4 = vld [vmem:[#allocation5 + $0x124] ss:$8 sps:$4 sm:$0xff]  }
  0x4d   :  { %774 = vmatpush1.bf16.msra.mxu0 %v1437_v1  ;;  %v1443_v5 = vld [vmem:[#allocation5 + $0x120] ss:$8 sps:$4 sm:$0xff]   ;;  %v1444_v6 = vld [vmem:[#allocation5 + $0x134] ss:$8 sps:$4 sm:$0xff]   ;;  %v1446_v7 = vld [vmem:[#allocation5 + $0x130] ss:$8 sps:$4 sm:$0xff]  }
  0x4e   :  { %775 = vmatprep.subr.bf16.mxu0 %v1438_v2  ;;  %v1447_v8 = vld [vmem:[#allocation5 + $0x144] ss:$8 sps:$4 sm:$0xff]   ;;  %v1449_v9 = vld [vmem:[#allocation5 + $0x140] ss:$8 sps:$4 sm:$0xff]   ;;  %v1450_v10 = vld [vmem:[#allocation5 + $0x154] ss:$8 sps:$4 sm:$0xff]  }
  0x4f   :  { %v1452_v11 = vld [vmem:[#allocation5 + $0x150] ss:$8 sps:$4 sm:$0xff]   ;;  %v1453_v12 = vld [vmem:[#allocation5 + $0x164] ss:$8 sps:$4 sm:$0xff]   ;;  %v1455_v14 = vld [vmem:[#allocation5 + $0x160] ss:$8 sps:$4 sm:$0xff]  }
  0x50   :  { %v1485_v13 = vld [vmem:[#allocation2 + $0xc] ss:$28 sps:$4 sm:$0xff]   ;;  %v1492_v16 = vld [vmem:[#allocation5 + $0x4] ss:$8 sps:$4 sm:$0xff]   ;;  %v1497_v19 = vld [vmem:[#allocation5] ss:$8 sps:$4 sm:$0xff]  }
  0x51   :  { %776 = vmatpush1.bf16.msra.mxu0 %v1440_v3  ;;  %v1456_v15 = vld [vmem:[#allocation5 + $0x174] ss:$8 sps:$4 sm:$0xff]   ;;  %805 = vmatprep.mubr.bf16.mxu0 %v1485_v13  ;;  %v1458_v17 = vld [vmem:[#allocation5 + $0x170] ss:$8 sps:$4 sm:$0xff]   ;;  %v1459_v18 = vld [vmem:[#allocation5 + $0x184] ss:$8 sps:$4 sm:$0xff]  }
  0x52   :  { %777 = vmatprep.subr.bf16.mxu0 %v1441_v4  ;;  %730 = vmatprep.subr.bf16.mxu1 %v1492_v16  ;;  %v1498_v20 = vld [vmem:[#allocation5 + $0x14] ss:$8 sps:$4 sm:$0xff]   ;;  %v1461_v21 = vld [vmem:[#allocation5 + $0x180] ss:$8 sps:$4 sm:$0xff]   ;;  %v1503_v22 = vld [vmem:[#allocation5 + $0x10] ss:$8 sps:$4 sm:$0xff]  }
  0x53   :  { %731 = vmatpush1.bf16.msra.mxu1 %v1497_v19  ;;  %v1504_v23 = vld [vmem:[#allocation5 + $0x24] ss:$8 sps:$4 sm:$0xff]   ;;  %v1462_v24 = vld [vmem:[#allocation5 + $0x194] ss:$8 sps:$4 sm:$0xff]   ;;  %v1509_v25 = vld [vmem:[#allocation5 + $0x20] ss:$8 sps:$4 sm:$0xff]  }
  0x54   :  { %732 = vmatprep.subr.bf16.mxu1 %v1498_v20  ;;  %v1510_v26 = vld [vmem:[#allocation5 + $0x34] ss:$8 sps:$4 sm:$0xff]   ;;  %v1464_v27 = vld [vmem:[#allocation5 + $0x190] ss:$8 sps:$4 sm:$0xff]   ;;  %v1465_v28 = vld [vmem:[#allocation5 + $0x1a4] ss:$8 sps:$4 sm:$0xff]  }
  0x55   :  { %778 = vmatpush1.bf16.msra.mxu0 %v1443_v5  ;;  %v1515_v29 = vld [vmem:[#allocation5 + $0x30] ss:$8 sps:$4 sm:$0xff]   ;;  %v1516_v30 = vld [vmem:[#allocation5 + $0x44] ss:$8 sps:$4 sm:$0xff]   ;;  %v1467_v31 = vld [vmem:[#allocation5 + $0x1a0] ss:$8 sps:$4 sm:$0xff]  }
  0x56   :  { %779 = vmatprep.subr.bf16.mxu0 %v1444_v6  ;;  %v1468_v32 = vld [vmem:[#allocation5 + $0x1b4] ss:$8 sps:$4 sm:$0xff]   ;;  %v1521_v33 = vld [vmem:[#allocation5 + $0x40] ss:$8 sps:$4 sm:$0xff]   ;;  %v1470_v35 = vld [vmem:[#allocation5 + $0x1b0] ss:$8 sps:$4 sm:$0xff]  }
  0x57   :  { %733 = vmatpush1.bf16.msra.mxu1 %v1503_v22  ;;  %v1522_v34 = vld [vmem:[#allocation5 + $0x54] ss:$8 sps:$4 sm:$0xff]   ;;  %v1471_v36 = vld [vmem:[#allocation5 + $0x1c4] ss:$8 sps:$4 sm:$0xff]   ;;  %v1527_v37 = vld [vmem:[#allocation5 + $0x50] ss:$8 sps:$4 sm:$0xff]  }
  0x58   :  { %734 = vmatprep.subr.bf16.mxu1 %v1504_v23  ;;  %v1528_v38 = vld [vmem:[#allocation5 + $0x64] ss:$8 sps:$4 sm:$0xff]   ;;  %v1473_v39 = vld [vmem:[#allocation5 + $0x1c0] ss:$8 sps:$4 sm:$0xff]   ;;  %v1474_v40 = vld [vmem:[#allocation5 + $0x1d4] ss:$8 sps:$4 sm:$0xff]  }
  0x59   :  { %780 = vmatpush1.bf16.msra.mxu0 %v1446_v7  ;;  %v1533_v41 = vld [vmem:[#allocation5 + $0x60] ss:$8 sps:$4 sm:$0xff]   ;;  %v1534_v42 = vld [vmem:[#allocation5 + $0x74] ss:$8 sps:$4 sm:$0xff]   ;;  %v1476_v43 = vld [vmem:[#allocation5 + $0x1d0] ss:$8 sps:$4 sm:$0xff]  }
  0x5a   :  { %781 = vmatprep.subr.bf16.mxu0 %v1447_v8  ;;  %v1477_v44 = vld [vmem:[#allocation5 + $0x1e4] ss:$8 sps:$4 sm:$0xff]   ;;  %v1539_v45 = vld [vmem:[#allocation5 + $0x70] ss:$8 sps:$4 sm:$0xff]   ;;  %v1479_v47 = vld [vmem:[#allocation5 + $0x1e0] ss:$8 sps:$4 sm:$0xff]  }
  0x5b   :  { %735 = vmatpush1.bf16.msra.mxu1 %v1509_v25  ;;  %v1540_v46 = vld [vmem:[#allocation5 + $0x84] ss:$8 sps:$4 sm:$0xff]   ;;  %v1480_v48 = vld [vmem:[#allocation5 + $0x1f4] ss:$8 sps:$4 sm:$0xff]   ;;  %v1545_v49 = vld [vmem:[#allocation5 + $0x80] ss:$8 sps:$4 sm:$0xff]  }
  0x5c   :  { %736 = vmatprep.subr.bf16.mxu1 %v1510_v26  ;;  %v1546_v50 = vld [vmem:[#allocation5 + $0x94] ss:$8 sps:$4 sm:$0xff]   ;;  %v1482_v51 = vld [vmem:[#allocation5 + $0x1f0] ss:$8 sps:$4 sm:$0xff]   ;;  %v1488_v52 = vld [vmem:[#allocation5 + $0x204] ss:$8 sps:$4 sm:$0xff]  }
  0x5d   :  { %782 = vmatpush1.bf16.msra.mxu0 %v1449_v9  ;;  %v1551_v53 = vld [vmem:[#allocation5 + $0x90] ss:$8 sps:$4 sm:$0xff]   ;;  %v1552_v55 = vld [vmem:[#allocation5 + $0xa4] ss:$8 sps:$4 sm:$0xff]   ;;  %v1486_v56 = vld [vmem:[#allocation5 + $0x200] ss:$8 sps:$4 sm:$0xff]  }
  0x5e   :  { %783 = vmatprep.subr.bf16.mxu0 %v1450_v10  ;;  %v1483_v54 = vld [vmem:[#allocation2 + $0x8] ss:$28 sps:$4 sm:$0xff]   ;;  %v1578_v57 = vld [vmem:[#allocation2 + $0x14] ss:$28 sps:$4 sm:$0xff]   ;;  %v1557_v59 = vld [vmem:[#allocation5 + $0xa0] ss:$8 sps:$4 sm:$0xff]  }
  0x5f   :  { %737 = vmatpush1.bf16.msra.mxu1 %v1515_v29  ;;  %v1491_v58 = vld [vmem:[#allocation5 + $0x214] ss:$8 sps:$4 sm:$0xff]   ;;  %v1489_v61 = vld [vmem:[#allocation5 + $0x210] ss:$8 sps:$4 sm:$0xff]   ;;  %v1496_v62 = vld [vmem:[#allocation5 + $0x224] ss:$8 sps:$4 sm:$0xff]  }
  0x60   :  { %738 = vmatprep.subr.bf16.mxu1 %v1516_v30  ;;  %v1558_v60 = vld [vmem:[#allocation5 + $0xb4] ss:$8 sps:$4 sm:$0xff]   ;;  %v1563_v63 = vld [vmem:[#allocation5 + $0xb0] ss:$8 sps:$4 sm:$0xff]   ;;  %v1590_v0 = vld [vmem:[#allocation2 + $0x4] ss:$28 sps:$4 sm:$0xff]  }
  0x61   :  { %784 = vmatpush1.bf16.msra.mxu0 %v1452_v11  ;;  %v1564_v1 = vld [vmem:[#allocation5 + $0xc4] ss:$8 sps:$4 sm:$0xff]   ;;  %v1494_v2 = vld [vmem:[#allocation5 + $0x220] ss:$8 sps:$4 sm:$0xff]   ;;  %762 = vmatprep.mubr.bf16.mxu1 %v1590_v0  ;;  %v1502_v3 = vld [vmem:[#allocation5 + $0x234] ss:$8 sps:$4 sm:$0xff]  }
  0x62   :  { %785 = vmatprep.subr.bf16.mxu0 %v1453_v12  ;;  %v1569_v4 = vld [vmem:[#allocation5 + $0xc0] ss:$8 sps:$4 sm:$0xff]   ;;  %v1570_v5 = vld [vmem:[#allocation5 + $0xd4] ss:$8 sps:$4 sm:$0xff]   ;;  %v1500_v6 = vld [vmem:[#allocation5 + $0x230] ss:$8 sps:$4 sm:$0xff]  }
  0x63   :  { %739 = vmatpush1.bf16.msra.mxu1 %v1521_v33  ;;  %v1508_v7 = vld [vmem:[#allocation5 + $0x244] ss:$8 sps:$4 sm:$0xff]   ;;  %v1506_v8 = vld [vmem:[#allocation5 + $0x240] ss:$8 sps:$4 sm:$0xff]   ;;  %v1575_v9 = vld [vmem:[#allocation5 + $0xd0] ss:$8 sps:$4 sm:$0xff]  }
  0x64   :  { %740 = vmatprep.subr.bf16.mxu1 %v1522_v34  ;;  %v1579_v10 = vld [vmem:[#allocation5 + $0xe4] ss:$8 sps:$4 sm:$0xff]   ;;  %v1514_v11 = vld [vmem:[#allocation5 + $0x254] ss:$8 sps:$4 sm:$0xff]   ;;  %v1584_v12 = vld [vmem:[#allocation5 + $0xe0] ss:$8 sps:$4 sm:$0xff]  }
  0x65   :  { %786 = vmatpush1.bf16.msra.mxu0 %v1455_v14  ;;  %v1585_v13 = vld [vmem:[#allocation5 + $0xf4] ss:$8 sps:$4 sm:$0xff]   ;;  %v1512_v14 = vld [vmem:[#allocation5 + $0x250] ss:$8 sps:$4 sm:$0xff]   ;;  %v1588_v20 = vld [vmem:[#allocation2] ss:$28 sps:$4 sm:$0xff]  }
  0x66   :  { %787 = vmatprep.subr.bf16.mxu0 %v1456_v15  ;;  %v1520_v15 = vld [vmem:[#allocation5 + $0x264] ss:$8 sps:$4 sm:$0xff]   ;;  %v1587_v16 = vld [vmem:[#allocation5 + $0xf0] ss:$8 sps:$4 sm:$0xff]   ;;  %v1526_v19 = vld [vmem:[#allocation5 + $0x274] ss:$8 sps:$4 sm:$0xff]  }
  0x67   :  { %741 = vmatpush1.bf16.msra.mxu1 %v1527_v37  ;;  %v1594_v22 = vld [vmem:[#allocation7 + $0x48] sm:$0xff]   ;;  %v1596_v26 = vld [vmem:[#allocation7 + $0x50] sm:$0xff]   ;;  %v1598_v30 = vld [vmem:[#allocation7 + $0x58] sm:$0xff]   ;;  %vm726_vm0 = vcmask 130048   ;;  %vm1746_vm1 = vmmov 0  }
  0x68   :  { %742 = vmatprep.subr.bf16.mxu1 %v1528_v38  ;;  %v1524_v23 = vld [vmem:[#allocation5 + $0x270] ss:$8 sps:$4 sm:$0xff]   ;;  %v1597_v29 = vld [vmem:[#allocation7 + $0x10] sm:$0xff]   ;;  %v1599_v33 = vld [vmem:[#allocation7 + $0x18] sm:$0xff]  }
  0x69   :  { %788 = vmatpush1.bf16.msra.mxu0 %v1458_v17  ;;  %v1592_v17 = vld [vmem:[#allocation7 + $0x40] sm:$0xff]   ;;  %v1595_v25 = vld [vmem:[#allocation7 + $0x8] sm:$0xff]   ;;  %v1556_v38 = vld [vmem:[#allocation5 + $0x2c4] ss:$8 sps:$4 sm:$0xff]  }
  0x6a   :  { %789 = vmatprep.subr.bf16.mxu0 %v1459_v18  ;;  %v1518_v18 = vld [vmem:[#allocation5 + $0x260] ss:$8 sps:$4 sm:$0xff]   ;;  %v1600_v34 = vld [vmem:[#allocation7 + $0x60] sm:$0xff]  }
  0x6b   :  { %743 = vmatpush1.bf16.msra.mxu1 %v1533_v41  ;;  %v1548_v37 = vld [vmem:[#allocation5 + $0x2b0] ss:$8 sps:$4 sm:$0xff]  }
  0x6c   :  { %744 = vmatprep.subr.bf16.mxu1 %v1534_v42  ;;  %v1560_v41 = vld [vmem:[#allocation5 + $0x2d0] ss:$8 sps:$4 sm:$0xff]   ;;  %v1568_v42 = vld [vmem:[#allocation5 + $0x2e4] ss:$8 sps:$4 sm:$0xff]  }
  0x6d   :  { %790 = vmatpush1.bf16.msra.mxu0 %v1461_v21  ;;  %v1593_v21 = vld [vmem:[#allocation7] sm:$0xff]  }
  0x6e   :  { %791 = vmatprep.subr.bf16.mxu0 %v1462_v24  ;;  %v1532_v24 = vld [vmem:[#allocation5 + $0x284] ss:$8 sps:$4 sm:$0xff]  }
  0x6f   :  { %745 = vmatpush1.bf16.msra.mxu1 %v1539_v45  ;;  %v1572_v45 = vld [vmem:[#allocation5 + $0x2f0] ss:$8 sps:$4 sm:$0xff]  }
  0x70   :  { %746 = vmatprep.subr.bf16.mxu1 %v1540_v46  ;;  %v1583_v46 = vld [vmem:[#allocation5 + $0x304] ss:$8 sps:$4 sm:$0xff]  }
  0x71   :  { %792 = vmatpush1.bf16.msra.mxu0 %v1464_v27  ;;  %v1530_v27 = vld [vmem:[#allocation5 + $0x280] ss:$8 sps:$4 sm:$0xff]  }
  0x72   :  { %793 = vmatprep.subr.bf16.mxu0 %v1465_v28  ;;  %v1538_v28 = vld [vmem:[#allocation5 + $0x294] ss:$8 sps:$4 sm:$0xff]  }
  0x73   :  { %747 = vmatpush1.bf16.msra.mxu1 %v1545_v49  ;;  %v1744_v49 = vmov 0  }
  0x74   :  { %748 = vmatprep.subr.bf16.mxu1 %v1546_v50  ;;  %v1591_v50 = vld [vmem:[#allocation2 + $0x18] ss:$28 sps:$4 sm:$0xff]  }
  0x75   :  { %794 = vmatpush1.bf16.msra.mxu0 %v1467_v31  ;;  %v1536_v31 = vld [vmem:[#allocation5 + $0x290] ss:$8 sps:$4 sm:$0xff]  }
  0x76   :  { %795 = vmatprep.subr.bf16.mxu0 %v1468_v32  ;;  %v1544_v32 = vld [vmem:[#allocation5 + $0x2a4] ss:$8 sps:$4 sm:$0xff]  }
  0x77   :  { %749 = vmatpush1.bf16.msra.mxu1 %v1551_v53  ;;  %v1603_v53 = vld [vmem:[#allocation7 + $0x28] sm:$0xff]  }
  0x78   :  { %750 = vmatprep.subr.bf16.mxu1 %v1552_v55  ;;  %v1605_v55 = vld [vmem:[#allocation7 + $0x30] sm:$0xff]  }
  0x79   :  { %796 = vmatpush1.bf16.msra.mxu0 %v1470_v35  ;;  %v1542_v35 = vld [vmem:[#allocation5 + $0x2a0] ss:$8 sps:$4 sm:$0xff]  }
  0x7a   :  { %797 = vmatprep.subr.bf16.mxu0 %v1471_v36  ;;  %v1550_v36 = vld [vmem:[#allocation5 + $0x2b4] ss:$8 sps:$4 sm:$0xff]  }
  0x7b   :  { %751 = vmatpush1.bf16.msra.mxu1 %v1557_v59 }
  0x7c   :  { %752 = vmatprep.subr.bf16.mxu1 %v1558_v60 }
  0x7d   :  { %798 = vmatpush1.bf16.msra.mxu0 %v1473_v39  ;;  %v1554_v39 = vld [vmem:[#allocation5 + $0x2c0] ss:$8 sps:$4 sm:$0xff]  }
  0x7e   :  { %799 = vmatprep.subr.bf16.mxu0 %v1474_v40  ;;  %v1562_v40 = vld [vmem:[#allocation5 + $0x2d4] ss:$8 sps:$4 sm:$0xff]  }
  0x7f   :  { %753 = vmatpush1.bf16.msra.mxu1 %v1563_v63  ;;  %v191_v63 = vlaneseq }
  0x80   :  { %754 = vmatprep.subr.bf16.mxu1 %v1564_v1 }
  0x81   :  { %800 = vmatpush1.bf16.msra.mxu0 %v1476_v43  ;;  %v1566_v43 = vld [vmem:[#allocation5 + $0x2e0] ss:$8 sps:$4 sm:$0xff]   ;;  %v192_v0 = vshrl.u32 %v191_v63, 7 }
  0x82   :  { %801 = vmatprep.subr.bf16.mxu0 %v1477_v44  ;;  %v1574_v44 = vld [vmem:[#allocation5 + $0x2f4] ss:$8 sps:$4 sm:$0xff]  }
  0x83   :  { %755 = vmatpush1.bf16.msra.mxu1 %v1569_v4  ;;  %v193_v1 = vsub.s32 0, %v192_v0 }
  0x84   :  { %756 = vmatprep.subr.bf16.mxu1 %v1570_v5 }
  0x85   :  { %802 = vmatpush1.bf16.msra.mxu0 %v1479_v47  ;;  %v1576_v47 = vld [vmem:[#allocation2 + $0x10] ss:$28 sps:$4 sm:$0xff]  }
  0x86   :  { %803 = vmatprep.subr.bf16.mxu0 %v1480_v48  ;;  %v1581_v48 = vld [vmem:[#allocation5 + $0x300] ss:$8 sps:$4 sm:$0xff]  }
  0x87   :  { %757 = vmatpush1.bf16.msra.mxu1 %v1575_v9 }
  0x88   :  { %758 = vmatprep.subr.bf16.mxu1 %v1579_v10 }
  0x89   :  { %804 = vmatpush1.bf16.msra.mxu0 %v1482_v51  ;;  %v1601_v51 = vld [vmem:[#allocation7 + $0x20] sm:$0xff]  }
  0x8a   :  { %816 = vmatprep.subr.bf16.mxu0 %v1488_v52  ;;  %v1602_v52 = vld [vmem:[#allocation7 + $0x68] sm:$0xff]  }
  0x8b   :  { %759 = vmatpush1.bf16.msra.mxu1 %v1584_v12 }
  0x8c   :  { %806 = vmatmul.mubr.bf16.vlgmr.msra.gmra.mrb[0].mxu0 %v1483_v54  ;;  %760 = vmatprep.subr.bf16.mxu1 %v1585_v13  ;;  %v1604_v54 = vld [vmem:[#allocation7 + $0x70] sm:$0xff]  }
  0x8d   :  { %817 = vmatpush1.bf16.msra.mxu0 %v1486_v56  ;;  %848 = vmatprep.mubr.bf16.mxu0 %v1578_v57  ;;  %v1606_v56 = vld [vmem:[#allocation7 + $0x78] sm:$0xff]  }
  0x8e   :  { %818 = vmatprep.subr.bf16.mxu0 %v1491_v58  ;;  %v1607_v57 = vld [vmem:[#allocation7 + $0x38] sm:$0xff]   ;;  %v1745_v58 = vmov 0.0  }
  0x8f   :  { %761 = vmatpush1.bf16.msra.mxu1 %v1587_v16 }
  0x90   :  { %1354 = vmatprep.subr.bf16.mxu1 %v1592_v17 }
  0x91   :  { %819 = vmatpush1.bf16.msra.mxu0 %v1489_v61 }
  0x92   :  { %820 = vmatprep.subr.bf16.mxu0 %v1496_v62  ;;  %763 = vmatmul.mubr.bf16.vlgmr.msra.gmra.mrb[0].mxu1 %v1588_v20 }
  0x93   :  { %1355 = vmatpush3.bf16.msra.mxu1 %v1593_v21 }
  0x94   :  { %1356 = vmatprep.subr.bf16.mxu1 %v1594_v22 }
  0x95   :  { %821 = vmatpush1.bf16.msra.mxu0 %v1494_v2  ;;  %v189_v2 = vld [vmem:[%s1865_s2] sm:$0x3] }
  0x96   :  { %822 = vmatprep.subr.bf16.mxu0 %v1502_v3  ;;  %v197_v3 = vsub.s32 1, %v192_v0  ;;  %v194_v4 = vrot.slane %v189_v2, %v193_v1 }
  0x97   :  { %1357 = vmatpush3.bf16.msra.mxu1 %v1595_v25  ;;  %v1609_v25 = vld [vmem:[#allocation8 + $0x8] sm:$0xff]  }
  0x98   :  { %1358 = vmatprep.subr.bf16.mxu1 %v1596_v26  ;;  %v198_v5 = vrot.slane %v189_v2, %v197_v3  ;;  %v1610_v26 = vld [vmem:[#allocation8 + $0x10] sm:$0xff]  }
  0x99   :  { %823 = vmatpush1.bf16.msra.mxu0 %v1500_v6 }
  0x9a   :  { %824 = vmatprep.subr.bf16.mxu0 %v1508_v7 }
  0x9b   :  { %1359 = vmatpush3.bf16.msra.mxu1 %v1597_v29  ;;  %v1613_v29 = vld [vmem:[#allocation8 + $0x28] sm:$0xff]  }
  0x9c   :  { %1360 = vmatprep.subr.bf16.mxu1 %v1598_v30  ;;  %v1614_v30 = vld [vmem:[#allocation8 + $0x30] sm:$0xff]  }
  0x9d   :  { %825 = vmatpush1.bf16.msra.mxu0 %v1506_v8 }
  0x9e   :  { %826 = vmatprep.subr.bf16.mxu0 %v1514_v11 }
  0x9f   :  { %1361 = vmatpush3.bf16.msra.mxu1 %v1599_v33  ;;  %v1328_v33 = vld [vmem:[%s1867_s4] ss:$0 sm:$0xff]  ;;  %s1747_s4 = smov [#allocation10]  }
  0xa0   :  { %1362 = vmatprep.subr.bf16.mxu1 %v1600_v34  ;;  %s1208_s13 = sshll.u32 %s1747_s4, 4  ;;  %s1209_s13 = int_to_ptr.vmem [resolvable:$true] %s1208_s13 }
  0xa1   :  { %827 = vmatpush1.bf16.msra.mxu0 %v1512_v14  ;;  %s1704_s14 = scalar_lea.vmem %s1209_s13, 256  ;;  %p1709_p5 = scmp.lt.s32.totalorder %s1209_s13, %s1209_s13 }
  0xa2   :  { %828 = vmatprep.subr.bf16.mxu0 %v1520_v15  ;;  %p1705_p4 = scmp.ne.s32.totalorder %s1209_s13, %s1704_s14  ;;  %p1710_p6 = scmp.lt.s32.totalorder %s1704_s14, %s1704_s14 }
  0xa3   :  { %1363 = vmatpush3.bf16.msra.mxu1 %v1601_v51 }
  0xa4   :  { %1364 = vmatprep.subr.bf16.mxu1 %v1602_v52  ;;  %p1711_p7 = por %p1710_p6, %p1709_p5 }
  0xa5   :  { %829 = vmatpush1.bf16.msra.mxu0 %v1518_v18 }
  0xa6   :  { %830 = vmatprep.subr.bf16.mxu0 %v1526_v19  ;;  %p1712_p8 = pnand %p1711_p7, %p1705_p4 }
  0xa7   :  { %1365 = vmatpush3.bf16.msra.mxu1 %v1603_v53 }
  0xa8   :  { %1366 = vmatprep.subr.bf16.mxu1 %v1604_v54 }
  0xa9   :  { %831 = vmatpush1.bf16.msra.mxu0 %v1524_v23 }
  0xaa   :  { %832 = vmatprep.subr.bf16.mxu0 %v1532_v24  ;;  %v1608_v24 = vld [vmem:[#allocation8] sm:$0xff]  }
  0xab   :  { %1367 = vmatpush3.bf16.msra.mxu1 %v1605_v55 }
  0xac   :  { %1368 = vmatprep.subr.bf16.mxu1 %v1606_v56 }
  0xad   :  { %833 = vmatpush1.bf16.msra.mxu0 %v1530_v27  ;;  %v1611_v27 = vld [vmem:[#allocation8 + $0x18] sm:$0xff]  }
  0xae   :  { %834 = vmatprep.subr.bf16.mxu0 %v1538_v28  ;;  %v1612_v28 = vld [vmem:[#allocation8 + $0x20] sm:$0xff]  }
  0xaf   :  { %1369 = vmatpush3.bf16.msra.mxu1 %v1607_v57 }
  0xb0   :  { %1385 = vmatprep.subr.bf16.mxu1 %v1745_v58 }
  0xb1   :  { %835 = vmatpush1.bf16.msra.mxu0 %v1536_v31  ;;  %v1615_v31 = vld [vmem:[#allocation8 + $0x38] sm:$0xff]  }
  0xb2   :  { %836 = vmatprep.subr.bf16.mxu0 %v1544_v32 }
  0xb5   :  { %837 = vmatpush1.bf16.msra.mxu0 %v1542_v35 }
  0xb6   :  { %838 = vmatprep.subr.bf16.mxu0 %v1550_v36 }
  0xb9   :  { %839 = vmatpush1.bf16.msra.mxu0 %v1548_v37 }
  0xba   :  { %840 = vmatprep.subr.bf16.mxu0 %v1556_v38 }
  0xbd   :  { %841 = vmatpush1.bf16.msra.mxu0 %v1554_v39 }
  0xbe   :  { %842 = vmatprep.subr.bf16.mxu0 %v1562_v40 }
  0xc1   :  { %843 = vmatpush1.bf16.msra.mxu0 %v1560_v41 }
  0xc2   :  { %844 = vmatprep.subr.bf16.mxu0 %v1568_v42 }
  0xc5   :  { %845 = vmatpush1.bf16.msra.mxu0 %v1566_v43 }
  0xc6   :  { %846 = vmatprep.subr.bf16.mxu0 %v1574_v44  ;;  %v1345_v44 = vld [vmem:[%s1869_s6] ss:$0 sm:$0xff] }
  0xc9   :  { %847 = vmatpush1.bf16.msra.mxu0 %v1572_v45 }
  0xca   :  { %859 = vmatprep.subr.bf16.mxu0 %v1583_v46 }
  0xcc   :  { %849 = vmatmul.mubr.bf16.vlgmr.msra.gmra.mrb[0].mxu0 %v1576_v47 }
  0xcd   :  { %860 = vmatpush1.bf16.msra.mxu0 %v1581_v48  ;;  %891 = vmatprep.mubr.bf16.mxu0 %v1744_v49 }
  0xd8   :  { %1327 = vmatmul.mubr.msk.bf16.vlgmr.msra.gmra.mrb[0].mxu0 %vm726_vm0, %v1591_v50 }
 0x165   :  { %v764_v59 = vpop.f32.mrb[0].mxu1 }
 0x166   :  { %v766_v60 = vpop.f32.mrb[1].mxu1  ;;  %v765_v6 = vadd.f32 %v764_v59, %v194_v4 }
 0x167   :  { %v768_v61 = vpop.f32.mrb[2].mxu1  ;;  %v767_v7 = vadd.f32 %v766_v60, %v198_v5 }
 0x168   :  { %v770_v62 = vpop.f32.mrb[3].mxu1  ;;  %v769_v9 = vadd.f32 %v768_v61, %v194_v4 }
 0x169   :  { %v771_v12 = vadd.f32 %v770_v62, %v198_v5 }
 0x1ab   :  { %v893_v8 = vpop.f32.mrb[0].mxu0 }
 0x1ac   :  { %v1406_v10 = vadd.f32 %v893_v8, %v765_v6  ;;  %v895_v11 = vpop.f32.mrb[1].mxu0 }
 0x1ad   :  { %v1408_v13 = vadd.f32 %v895_v11, %v767_v7  ;;  %v897_v14 = vpop.f32.mrb[2].mxu0 }
 0x1ae   :  { %v1410_v15 = vadd.f32 %v897_v14, %v769_v9  ;;  %v899_v16 = vpop.f32.mrb[3].mxu0  ;;  %v902_v18 = vmax.f32 %v1406_v10, 0.0 }
 0x1af   :  { %v1412_v17 = vadd.f32 %v899_v16, %v771_v12  ;;  %v903_v20 = vmax.f32 %v1408_v13, 0.0 }
 0x1b0   :  { %v904_v19 = vmax.f32 %v1410_v15, 0.0 }
 0x1b1   :  { %v905_v21 = vmax.f32 %v1412_v17, 0.0 }
 0x1b2   :  { %v906_v22 = vpack.c.bf16 %v904_v19, %v902_v18 }
 0x1b3   :  { %v907_v23 = vpack.c.bf16 %v905_v21, %v903_v20 }
 0x1b5   :  { %1075 = vmatprep.mubr.bf16.mxu1 %v907_v23 }
 0x1b6   :  { %1076 = vmatmul.mubr.bf16.vlgmr.msra.gmra.mrb[4].mxu1 %v906_v22 }
 0x1b7   :  { %1386 = vmatpush3.bf16.msra.mxu1 %v1608_v24  ;;  %1401 = vmatprep.mubr.msk.bf16.mxu1 %vm1746_vm1, %v1745_v58 }
 0x1b8   :  { %1387 = vmatprep.subr.bf16.mxu1 %v1745_v58 }
 0x1bb   :  { %1388 = vmatpush3.bf16.msra.mxu1 %v1609_v25 }
 0x1bc   :  { %1389 = vmatprep.subr.bf16.mxu1 %v1745_v58 }
 0x1bf   :  { %1390 = vmatpush3.bf16.msra.mxu1 %v1610_v26 }
 0x1c0   :  { %1391 = vmatprep.subr.bf16.mxu1 %v1745_v58 }
 0x1c3   :  { %1392 = vmatpush3.bf16.msra.mxu1 %v1611_v27 }
 0x1c4   :  { %1393 = vmatprep.subr.bf16.mxu1 %v1745_v58 }
 0x1c7   :  { %1394 = vmatpush3.bf16.msra.mxu1 %v1612_v28 }
 0x1c8   :  { %1395 = vmatprep.subr.bf16.mxu1 %v1745_v58 }
 0x1cb   :  { %1396 = vmatpush3.bf16.msra.mxu1 %v1613_v29 }
 0x1cc   :  { %1397 = vmatprep.subr.bf16.mxu1 %v1745_v58 }
 0x1cf   :  { %1398 = vmatpush3.bf16.msra.mxu1 %v1614_v30 }
 0x1d0   :  { %1399 = vmatprep.subr.bf16.mxu1 %v1745_v58 }
 0x1d3   :  { %1400 = vmatpush3.bf16.msra.mxu1 %v1615_v31 }
 0x289   :  { %v1370_v32 = vpop.f32.mrb[4].mxu1 }
 0x28a   :  { %v1371_v34 = vpop.f32.mrb[5].mxu1 }
 0x28b   :  { %v1372_v35 = vadd.f32 %v1371_v34, %v1370_v32  ;;  %v1373_v36 = vpop.f32.mrb[6].mxu1 }
 0x28c   :  { %v1374_v37 = vpop.f32.mrb[7].mxu1 }
 0x28d   :  { %v1078_v38 = vadd.f32 %v1372_v35, %v1328_v33  ;;  %v1375_v39 = vadd.f32 %v1374_v37, %v1373_v36 }
 0x28f   :  { %v1081_v40 = vadd.f32 %v1375_v39, %v1328_v33  ;;  %v1084_v41 = vmax.f32 %v1078_v38, 0.0 }
 0x291   :  { %v1085_v42 = vmax.f32 %v1081_v40, 0.0 }
 0x293   :  { %v1086_v43 = vpack.c.bf16 %v1085_v42, %v1084_v41 }
 0x295   :  { %1402 = vmatmul.mubr.bf16.vlgmr.msra.gmra.mrb[8].mxu1 %v1086_v43 }
 0x368   :  { %v1192_v45 = vpop.f32.mrb[8].mxu1 }
 0x369   :  { %v1193_v46 = vadd.f32 %v1345_v44, %v1192_v45  ;;  %v1403_v47 = vpop.f32.mrb[9].mxu1 }
 0x36a   :  { %v1195_v48 = vpop.f32.mrb[10].mxu1 }
 0x36b   :  { %v1199_v49 = vmax.f32 %v1193_v46, 0.0  ;;  %v1196_v50 = vadd.f32 %v1345_v44, %v1195_v48  ;;  %v1404_v51 = vpop.f32.mrb[11].mxu1 }
 0x36d   :  { %1201 = vst [vmem:[#allocation10] sm:$0xff] %v1199_v49  ;;  %v1200_v52 = vmax.f32 %v1196_v50, 0.0 }
 0x36f   :  { %1202 = vst [vmem:[#allocation10 + $0x8] sm:$0xff] %v1200_v52 }
 0x370   :  { %1715 = shalt.err (!%p1712_p8)
}
 0x371   :  { %s1716_s17 = scalar_lea.hbm %s1870_s7, 256 }
 0x372   :  { %p1717_p9 = scmp.ne.s32.totalorder %s1870_s7, %s1716_s17  ;;  %p1720_p10 = scmp.lt.u32.totalorder %s1716_s17, %s1870_s7 }
 0x374   :  { %p1722_p11 = pnand %p1720_p10, %p1717_p9 }
 0x376   :  { %1725 = shalt.err (!%p1722_p11)
}
 0x377   :  { %1214 = dma.vmem_to_hbm [thread:$0]  %s1209_s13, 256, %s1870_s7, [#allocation4], %s1735_s11, %s1735_s11, %s1736_s12  }
 0x378   :  { %1732 = dma.done.wait [#allocation4], 256  }
 0x379   :  { %1733 = vsyncadd [#allocation4], 4294967040 }
 0x37a   :  { %1218 = vsyncpa [#allocation3], 1 }
 0x37b   :  { %1219 = vsyncpa [#allocation6], 1 }
 0x37c   :  { %1220 = vsyncpa [#allocation9], 1 }
 0x37d   :  { %1221 = vsyncpa [#allocation4], 1 }

</bundles_post_ra>
